<compile_context>
chip_gen: v5e
topology: v5e:2x2
jax: 0.10.0
libtpu: 0.0.40
codegen_flags: <defaults>
</compile_context>

<pallas_src>
import jax
import jax.numpy as jnp
from jax import lax
from jax.experimental import pallas as pl
from jax.experimental.pallas import tpu as pltpu

INPUT_SIZE = 70
HIDDEN1 = 32
HIDDEN2 = 32
HIDDEN3 = 16
HIDDEN4 = 16
LATENT = 16
BN_EPS = 1e-5

LANES = 128
STRIPE = 128  # every weight block is zero-padded to a [128, 128] stripe

# ---- parameter-slab row layout ----------------------------------------------
ROW_W1 = 0 * STRIPE          # [INPUT_SIZE, HIDDEN1] in rows 0..69,  lanes 0..31
ROW_W2 = 1 * STRIPE          # [HIDDEN1, HIDDEN2]    in rows 0..31,  lanes 0..31
ROW_W3 = 2 * STRIPE          # [HIDDEN2, HIDDEN3]    in rows 0..31,  lanes 0..15
ROW_W4 = 3 * STRIPE          # [HIDDEN3, HIDDEN4]    in rows 0..15,  lanes 0..15
ROW_WMV = 4 * STRIPE         # fused [HIDDEN4, 2*LATENT] head, lanes 0..31
ROW_VEC = 5 * STRIPE         # 1-row vectors below (each zero-padded to 128 lanes)
ROW_B1, ROW_G1, ROW_BE1 = ROW_VEC + 0, ROW_VEC + 1, ROW_VEC + 2
ROW_B2, ROW_G2, ROW_BE2 = ROW_VEC + 3, ROW_VEC + 4, ROW_VEC + 5
ROW_B3, ROW_G3, ROW_BE3 = ROW_VEC + 6, ROW_VEC + 7, ROW_VEC + 8
ROW_B4, ROW_G4, ROW_BE4 = ROW_VEC + 9, ROW_VEC + 10, ROW_VEC + 11
ROW_BMV = ROW_VEC + 12       # fused head bias: mean bias lanes 0..15, logvar 16..31
SLAB_ROWS = ROW_VEC + 16     # 656 rows (multiple of 8), 656*128*4 B = 328 KiB


def _bn_relu(h, gamma, beta):
    """BatchNorm1d (training-mode batch stats, biased variance) + ReLU.

    One-pass stats (var = E[h^2] - mu^2, clamped >= 0); gamma/beta folded into
    a [1, 128] scale/shift so the wide [N, 128] work is one multiply-add.
    Padded lanes: bias/gamma/beta are zero there, so h stays exactly 0.
    """
    mu = jnp.mean(h, axis=0, keepdims=True)
    ex2 = jnp.mean(h * h, axis=0, keepdims=True)
    var = jnp.maximum(ex2 - mu * mu, 0.0)
    scale = gamma * lax.rsqrt(var + BN_EPS)
    shift = beta - mu * scale
    return jnp.maximum(h * scale + shift, 0.0)
    # TODO(synk): for N in the thousands, move mu/ex2 onto the idle MXU via
    # jnp.dot(ones((1, N)), ...) to shorten the per-layer XLU reduce chain.


def encoder_kernel(x_ref, eps_ref, slab_ref, out_ref):
    def vec(r):
        # Full-lane [1, 128] row of the parameter slab (zero-cost static view).
        return slab_ref[r:r + 1, :]

    def stripe(r):
        # Full [128, 128] zero-padded weight stripe.
        return slab_ref[r:r + STRIPE, :]

    x = x_ref[...]                       # [N, 128], lanes 70..127 are zero

    h = jnp.dot(x, stripe(ROW_W1), preferred_element_type=jnp.float32) + vec(ROW_B1)
    h = _bn_relu(h, vec(ROW_G1), vec(ROW_BE1))

    h = jnp.dot(h, stripe(ROW_W2), preferred_element_type=jnp.float32) + vec(ROW_B2)
    h = _bn_relu(h, vec(ROW_G2), vec(ROW_BE2))

    h = jnp.dot(h, stripe(ROW_W3), preferred_element_type=jnp.float32) + vec(ROW_B3)
    h = _bn_relu(h, vec(ROW_G3), vec(ROW_BE3))

    h = jnp.dot(h, stripe(ROW_W4), preferred_element_type=jnp.float32) + vec(ROW_B4)
    h = _bn_relu(h, vec(ROW_G4), vec(ROW_BE4))

    # Fused mean|logvar head: one [128, 128] matmul; mean in lanes 0..15,
    # logvar in lanes 16..31, lanes 32..127 exactly zero.
    mv = jnp.dot(h, stripe(ROW_WMV), preferred_element_type=jnp.float32) + vec(ROW_BMV)

    mean = mv[:, 0:LATENT]
    logvar = mv[:, LATENT:2 * LATENT]
    std = jnp.exp(0.5 * logvar)
    latent = eps_ref[...] * std + mean

    # Output block [mean | logvar | latent] via two stores (no concatenate).
    out_ref[:, 0:2 * LATENT] = mv[:, 0:2 * LATENT]
    out_ref[:, 2 * LATENT:3 * LATENT] = latent


@jax.jit
def encoder_forward(x, eps, slab):
    n = x.shape[0]
    # Lane-pad x to 128 so the kernel never touches a sub-128-lane operand.
    x_pad = jnp.pad(x, ((0, 0), (0, LANES - INPUT_SIZE)))
    vmem = pl.BlockSpec(memory_space=pltpu.MemorySpace.VMEM)
    out = pl.pallas_call(
        encoder_kernel,
        out_shape=jax.ShapeDtypeStruct((n, 3 * LATENT), jnp.float32),
        in_specs=[vmem, vmem, vmem],
        out_specs=vmem,
        compiler_params=pltpu.CompilerParams(
            # Bump v5e's 16 MiB default scoped limit; within v6e/v7x defaults.
            vmem_limit_bytes=32 * 1024 * 1024),
    )(x_pad, eps, slab)
    mean = out[:, 0:LATENT]
    logvar = out[:, LATENT:2 * LATENT]
    latent = out[:, 2 * LATENT:3 * LATENT]
    return latent, mean, logvar


def init_params(key):
    """Deterministic params mirroring the module's layer shapes.

    Linear weights: uniform +-1/sqrt(fan_in) (PyTorch default); mean/logvar
    heads xavier-uniform; BatchNorm gamma=1, beta=0.  Weights stored [in, out].
    """
    dims = [
        (INPUT_SIZE, HIDDEN1),   # input_to_hidden1
        (HIDDEN1, HIDDEN2),      # hidden1_to_hidden2
        (HIDDEN2, HIDDEN3),      # hidden2_to_hidden3
        (HIDDEN3, HIDDEN4),      # hidden3_to_hidden4
    ]
    params = []
    keys = jax.random.split(key, 16)
    ki = 0
    for fan_in, fan_out in dims:
        bound = 1.0 / jnp.sqrt(float(fan_in))
        w = jax.random.uniform(keys[ki], (fan_in, fan_out), jnp.float32, -bound, bound)
        ki += 1
        b = jax.random.uniform(keys[ki], (1, fan_out), jnp.float32, -bound, bound)
        ki += 1
        gamma = jnp.ones((1, fan_out), jnp.float32)
        beta = jnp.zeros((1, fan_out), jnp.float32)
        params.extend([w, b, gamma, beta])

    # hidden4_to_mean / hidden4_to_logvar: xavier-uniform weights, default bias.
    for _ in range(2):
        xav = jnp.sqrt(6.0 / float(HIDDEN4 + LATENT))
        w = jax.random.uniform(keys[ki], (HIDDEN4, LATENT), jnp.float32, -xav, xav)
        ki += 1
        bbound = 1.0 / jnp.sqrt(float(HIDDEN4))
        b = jax.random.uniform(keys[ki], (1, LATENT), jnp.float32, -bbound, bbound)
        ki += 1
        params.extend([w, b])

    return tuple(params)


def pack_params(params):
    """Pack the 20 small arrays into one [SLAB_ROWS, 128] zero-padded slab.

    Each weight block gets a full 128x128 stripe; each bias/gamma/beta row is
    zero-padded to 128 lanes (gamma padding = 0 so padded lanes stay zero
    through BatchNorm + ReLU inside the kernel).
    """
    (w1, b1, g1, be1, w2, b2, g2, be2, w3, b3, g3, be3,
     w4, b4, g4, be4, wm, bm, wv, bv) = params

    slab = jnp.zeros((SLAB_ROWS, LANES), jnp.float32)
    slab = slab.at[ROW_W1:ROW_W1 + INPUT_SIZE, 0:HIDDEN1].set(w1)
    slab = slab.at[ROW_W2:ROW_W2 + HIDDEN1, 0:HIDDEN2].set(w2)
    slab = slab.at[ROW_W3:ROW_W3 + HIDDEN2, 0:HIDDEN3].set(w3)
    slab = slab.at[ROW_W4:ROW_W4 + HIDDEN3, 0:HIDDEN4].set(w4)
    slab = slab.at[ROW_WMV:ROW_WMV + HIDDEN4, 0:LATENT].set(wm)
    slab = slab.at[ROW_WMV:ROW_WMV + HIDDEN4, LATENT:2 * LATENT].set(wv)

    slab = slab.at[ROW_B1, 0:HIDDEN1].set(b1[0])
    slab = slab.at[ROW_G1, 0:HIDDEN1].set(g1[0])
    slab = slab.at[ROW_BE1, 0:HIDDEN1].set(be1[0])
    slab = slab.at[ROW_B2, 0:HIDDEN2].set(b2[0])
    slab = slab.at[ROW_G2, 0:HIDDEN2].set(g2[0])
    slab = slab.at[ROW_BE2, 0:HIDDEN2].set(be2[0])
    slab = slab.at[ROW_B3, 0:HIDDEN3].set(b3[0])
    slab = slab.at[ROW_G3, 0:HIDDEN3].set(g3[0])
    slab = slab.at[ROW_BE3, 0:HIDDEN3].set(be3[0])
    slab = slab.at[ROW_B4, 0:HIDDEN4].set(b4[0])
    slab = slab.at[ROW_G4, 0:HIDDEN4].set(g4[0])
    slab = slab.at[ROW_BE4, 0:HIDDEN4].set(be4[0])
    slab = slab.at[ROW_BMV, 0:LATENT].set(bm[0])
    slab = slab.at[ROW_BMV, LATENT:2 * LATENT].set(bv[0])
    return slab


def reference_forward(x, eps, params):
    """Pure-JAX reference (two-pass BN variance, separate heads)."""
    (w1, b1, g1, be1, w2, b2, g2, be2, w3, b3, g3, be3,
     w4, b4, g4, be4, wm, bm, wv, bv) = params

    def bn_relu(h, g, b):
        mu = jnp.mean(h, axis=0, keepdims=True)
        var = jnp.mean((h - mu) ** 2, axis=0, keepdims=True)
        return jnp.maximum((h - mu) / jnp.sqrt(var + BN_EPS) * g + b, 0.0)

    h1 = bn_relu(x @ w1 + b1, g1, be1)
    h2 = bn_relu(h1 @ w2 + b2, g2, be2)
    h3 = bn_relu(h2 @ w3 + b3, g3, be3)
    h4 = bn_relu(h3 @ w4 + b4, g4, be4)
    mean = h4 @ wm + bm
    logvar = h4 @ wv + bv
    std = jnp.exp(0.5 * logvar)
    return eps * std + mean, mean, logvar


if __name__ == "__main__":
    key = jax.random.PRNGKey(0)
    k_param, k_x, k_eps = jax.random.split(key, 3)

    batch = 8
    x = jax.random.normal(k_x, (batch, INPUT_SIZE), jnp.float32)
    # torch.randn_like(std) done host-side in JAX; consumed inside the kernel.
    eps = jax.random.normal(k_eps, (batch, LATENT), jnp.float32)

    params = init_params(k_param)
    slab = pack_params(params)

    latent, latent_mean, latent_logvar = encoder_forward(x, eps, slab)
    jax.block_until_ready((latent, latent_mean, latent_logvar))

    # Sanity check against pure-JAX reference.
    ref_latent, ref_mean, ref_logvar = reference_forward(x, eps, params)
    assert jnp.allclose(latent, ref_latent, atol=1e-4, rtol=1e-4)
    assert jnp.allclose(latent_mean, ref_mean, atol=1e-4, rtol=1e-4)
    assert jnp.allclose(latent_logvar, ref_logvar, atol=1e-4, rtol=1e-4)

    print("KERNEL_OK")
</pallas_src>

<mosaic_0001>
module attributes {stable_mosaic.version = 11 : i64} {
  func.func @encoder_kernel(%arg0: memref<8x128xf32, #tpu.memory_space<vmem>>, %arg1: memref<8x16xf32, #tpu.memory_space<vmem>>, %arg2: memref<656x128xf32, #tpu.memory_space<vmem>>, %arg3: memref<8x48xf32, #tpu.memory_space<vmem>>) attributes {dimension_semantics = [], scalar_prefetch = 0 : i64, scratch_operands = 0 : i64, tpu.core_type = #tpu.core_type<tc>} {
    %c0 = arith.constant 0 : index
    %c0_0 = arith.constant 0 : index
    %0 = vector.load %arg0[%c0, %c0_0] : memref<8x128xf32, #tpu.memory_space<vmem>>, vector<8x128xf32>
    %c0_1 = arith.constant 0 : index
    %c0_2 = arith.constant 0 : index
    %1 = vector.load %arg2[%c0_1, %c0_2] : memref<656x128xf32, #tpu.memory_space<vmem>>, vector<128x128xf32>
    %cst = arith.constant dense<0.000000e+00> : vector<8x128xf32>
    %2 = tpu.matmul %0, %1, %cst {dimension_numbers = #tpu.dot_dimension_numbers<[1], [0], [0], [1], [0, 0, 1, 1], [], []>} : vector<8x128xf32>, vector<128x128xf32>, vector<8x128xf32> -> vector<8x128xf32>
    %c640 = arith.constant 640 : index
    %c0_3 = arith.constant 0 : index
    %3 = vector.load %arg2[%c640, %c0_3] : memref<656x128xf32, #tpu.memory_space<vmem>>, vector<1x128xf32>
    %4 = vector.broadcast %3 : vector<1x128xf32> to vector<8x128xf32>
    %5 = arith.addf %2, %4 : vector<8x128xf32>
    %c641 = arith.constant 641 : index
    %c0_4 = arith.constant 0 : index
    %6 = vector.load %arg2[%c641, %c0_4] : memref<656x128xf32, #tpu.memory_space<vmem>>, vector<1x128xf32>
    %c642 = arith.constant 642 : index
    %c0_5 = arith.constant 0 : index
    %7 = vector.load %arg2[%c642, %c0_5] : memref<656x128xf32, #tpu.memory_space<vmem>>, vector<1x128xf32>
    %cst_6 = arith.constant dense<0.000000e+00> : vector<128xf32>
    %8 = vector.multi_reduction <add>, %5, %cst_6 [0] : vector<8x128xf32> to vector<128xf32>
    %9 = vector.shape_cast %8 : vector<128xf32> to vector<1x128xf32>
    %cst_7 = arith.constant 8.000000e+00 : f32
    %10 = vector.broadcast %cst_7 : f32 to vector<1x128xf32>
    %11 = arith.divf %9, %10 : vector<1x128xf32>
    %12 = arith.mulf %5, %5 : vector<8x128xf32>
    %cst_8 = arith.constant dense<0.000000e+00> : vector<128xf32>
    %13 = vector.multi_reduction <add>, %12, %cst_8 [0] : vector<8x128xf32> to vector<128xf32>
    %14 = vector.shape_cast %13 : vector<128xf32> to vector<1x128xf32>
    %cst_9 = arith.constant 8.000000e+00 : f32
    %15 = vector.broadcast %cst_9 : f32 to vector<1x128xf32>
    %16 = arith.divf %14, %15 : vector<1x128xf32>
    %17 = arith.mulf %11, %11 : vector<1x128xf32>
    %18 = arith.subf %16, %17 : vector<1x128xf32>
    %cst_10 = arith.constant 0.000000e+00 : f32
    %19 = vector.broadcast %cst_10 : f32 to vector<1x128xf32>
    %20 = arith.maximumf %18, %19 : vector<1x128xf32>
    %cst_11 = arith.constant 9.99999974E-6 : f32
    %21 = vector.broadcast %cst_11 : f32 to vector<1x128xf32>
    %22 = arith.addf %20, %21 : vector<1x128xf32>
    %23 = math.rsqrt %22 : vector<1x128xf32>
    %24 = arith.mulf %6, %23 : vector<1x128xf32>
    %25 = arith.mulf %11, %24 : vector<1x128xf32>
    %26 = arith.subf %7, %25 : vector<1x128xf32>
    %27 = vector.broadcast %24 : vector<1x128xf32> to vector<8x128xf32>
    %28 = arith.mulf %5, %27 : vector<8x128xf32>
    %29 = vector.broadcast %26 : vector<1x128xf32> to vector<8x128xf32>
    %30 = arith.addf %28, %29 : vector<8x128xf32>
    %cst_12 = arith.constant 0.000000e+00 : f32
    %31 = vector.broadcast %cst_12 : f32 to vector<8x128xf32>
    %32 = arith.maximumf %30, %31 : vector<8x128xf32>
    %c128 = arith.constant 128 : index
    %c0_13 = arith.constant 0 : index
    %33 = vector.load %arg2[%c128, %c0_13] : memref<656x128xf32, #tpu.memory_space<vmem>>, vector<128x128xf32>
    %cst_14 = arith.constant dense<0.000000e+00> : vector<8x128xf32>
    %34 = tpu.matmul %32, %33, %cst_14 {dimension_numbers = #tpu.dot_dimension_numbers<[1], [0], [0], [1], [0, 0, 1, 1], [], []>} : vector<8x128xf32>, vector<128x128xf32>, vector<8x128xf32> -> vector<8x128xf32>
    %c643 = arith.constant 643 : index
    %c0_15 = arith.constant 0 : index
    %35 = vector.load %arg2[%c643, %c0_15] : memref<656x128xf32, #tpu.memory_space<vmem>>, vector<1x128xf32>
    %36 = vector.broadcast %35 : vector<1x128xf32> to vector<8x128xf32>
    %37 = arith.addf %34, %36 : vector<8x128xf32>
    %c644 = arith.constant 644 : index
    %c0_16 = arith.constant 0 : index
    %38 = vector.load %arg2[%c644, %c0_16] : memref<656x128xf32, #tpu.memory_space<vmem>>, vector<1x128xf32>
    %c645 = arith.constant 645 : index
    %c0_17 = arith.constant 0 : index
    %39 = vector.load %arg2[%c645, %c0_17] : memref<656x128xf32, #tpu.memory_space<vmem>>, vector<1x128xf32>
    %cst_18 = arith.constant dense<0.000000e+00> : vector<128xf32>
    %40 = vector.multi_reduction <add>, %37, %cst_18 [0] : vector<8x128xf32> to vector<128xf32>
    %41 = vector.shape_cast %40 : vector<128xf32> to vector<1x128xf32>
    %cst_19 = arith.constant 8.000000e+00 : f32
    %42 = vector.broadcast %cst_19 : f32 to vector<1x128xf32>
    %43 = arith.divf %41, %42 : vector<1x128xf32>
    %44 = arith.mulf %37, %37 : vector<8x128xf32>
    %cst_20 = arith.constant dense<0.000000e+00> : vector<128xf32>
    %45 = vector.multi_reduction <add>, %44, %cst_20 [0] : vector<8x128xf32> to vector<128xf32>
    %46 = vector.shape_cast %45 : vector<128xf32> to vector<1x128xf32>
    %cst_21 = arith.constant 8.000000e+00 : f32
    %47 = vector.broadcast %cst_21 : f32 to vector<1x128xf32>
    %48 = arith.divf %46, %47 : vector<1x128xf32>
    %49 = arith.mulf %43, %43 : vector<1x128xf32>
    %50 = arith.subf %48, %49 : vector<1x128xf32>
    %cst_22 = arith.constant 0.000000e+00 : f32
    %51 = vector.broadcast %cst_22 : f32 to vector<1x128xf32>
    %52 = arith.maximumf %50, %51 : vector<1x128xf32>
    %cst_23 = arith.constant 9.99999974E-6 : f32
    %53 = vector.broadcast %cst_23 : f32 to vector<1x128xf32>
    %54 = arith.addf %52, %53 : vector<1x128xf32>
    %55 = math.rsqrt %54 : vector<1x128xf32>
    %56 = arith.mulf %38, %55 : vector<1x128xf32>
    %57 = arith.mulf %43, %56 : vector<1x128xf32>
    %58 = arith.subf %39, %57 : vector<1x128xf32>
    %59 = vector.broadcast %56 : vector<1x128xf32> to vector<8x128xf32>
    %60 = arith.mulf %37, %59 : vector<8x128xf32>
    %61 = vector.broadcast %58 : vector<1x128xf32> to vector<8x128xf32>
    %62 = arith.addf %60, %61 : vector<8x128xf32>
    %cst_24 = arith.constant 0.000000e+00 : f32
    %63 = vector.broadcast %cst_24 : f32 to vector<8x128xf32>
    %64 = arith.maximumf %62, %63 : vector<8x128xf32>
    %c256 = arith.constant 256 : index
    %c0_25 = arith.constant 0 : index
    %65 = vector.load %arg2[%c256, %c0_25] : memref<656x128xf32, #tpu.memory_space<vmem>>, vector<128x128xf32>
    %cst_26 = arith.constant dense<0.000000e+00> : vector<8x128xf32>
    %66 = tpu.matmul %64, %65, %cst_26 {dimension_numbers = #tpu.dot_dimension_numbers<[1], [0], [0], [1], [0, 0, 1, 1], [], []>} : vector<8x128xf32>, vector<128x128xf32>, vector<8x128xf32> -> vector<8x128xf32>
    %c646 = arith.constant 646 : index
    %c0_27 = arith.constant 0 : index
    %67 = vector.load %arg2[%c646, %c0_27] : memref<656x128xf32, #tpu.memory_space<vmem>>, vector<1x128xf32>
    %68 = vector.broadcast %67 : vector<1x128xf32> to vector<8x128xf32>
    %69 = arith.addf %66, %68 : vector<8x128xf32>
    %c647 = arith.constant 647 : index
    %c0_28 = arith.constant 0 : index
    %70 = vector.load %arg2[%c647, %c0_28] : memref<656x128xf32, #tpu.memory_space<vmem>>, vector<1x128xf32>
    %c648 = arith.constant 648 : index
    %c0_29 = arith.constant 0 : index
    %71 = vector.load %arg2[%c648, %c0_29] : memref<656x128xf32, #tpu.memory_space<vmem>>, vector<1x128xf32>
    %cst_30 = arith.constant dense<0.000000e+00> : vector<128xf32>
    %72 = vector.multi_reduction <add>, %69, %cst_30 [0] : vector<8x128xf32> to vector<128xf32>
    %73 = vector.shape_cast %72 : vector<128xf32> to vector<1x128xf32>
    %cst_31 = arith.constant 8.000000e+00 : f32
    %74 = vector.broadcast %cst_31 : f32 to vector<1x128xf32>
    %75 = arith.divf %73, %74 : vector<1x128xf32>
    %76 = arith.mulf %69, %69 : vector<8x128xf32>
    %cst_32 = arith.constant dense<0.000000e+00> : vector<128xf32>
    %77 = vector.multi_reduction <add>, %76, %cst_32 [0] : vector<8x128xf32> to vector<128xf32>
    %78 = vector.shape_cast %77 : vector<128xf32> to vector<1x128xf32>
    %cst_33 = arith.constant 8.000000e+00 : f32
    %79 = vector.broadcast %cst_33 : f32 to vector<1x128xf32>
    %80 = arith.divf %78, %79 : vector<1x128xf32>
    %81 = arith.mulf %75, %75 : vector<1x128xf32>
    %82 = arith.subf %80, %81 : vector<1x128xf32>
    %cst_34 = arith.constant 0.000000e+00 : f32
    %83 = vector.broadcast %cst_34 : f32 to vector<1x128xf32>
    %84 = arith.maximumf %82, %83 : vector<1x128xf32>
    %cst_35 = arith.constant 9.99999974E-6 : f32
    %85 = vector.broadcast %cst_35 : f32 to vector<1x128xf32>
    %86 = arith.addf %84, %85 : vector<1x128xf32>
    %87 = math.rsqrt %86 : vector<1x128xf32>
    %88 = arith.mulf %70, %87 : vector<1x128xf32>
    %89 = arith.mulf %75, %88 : vector<1x128xf32>
    %90 = arith.subf %71, %89 : vector<1x128xf32>
    %91 = vector.broadcast %88 : vector<1x128xf32> to vector<8x128xf32>
    %92 = arith.mulf %69, %91 : vector<8x128xf32>
    %93 = vector.broadcast %90 : vector<1x128xf32> to vector<8x128xf32>
    %94 = arith.addf %92, %93 : vector<8x128xf32>
    %cst_36 = arith.constant 0.000000e+00 : f32
    %95 = vector.broadcast %cst_36 : f32 to vector<8x128xf32>
    %96 = arith.maximumf %94, %95 : vector<8x128xf32>
    %c384 = arith.constant 384 : index
    %c0_37 = arith.constant 0 : index
    %97 = vector.load %arg2[%c384, %c0_37] : memref<656x128xf32, #tpu.memory_space<vmem>>, vector<128x128xf32>
    %cst_38 = arith.constant dense<0.000000e+00> : vector<8x128xf32>
    %98 = tpu.matmul %96, %97, %cst_38 {dimension_numbers = #tpu.dot_dimension_numbers<[1], [0], [0], [1], [0, 0, 1, 1], [], []>} : vector<8x128xf32>, vector<128x128xf32>, vector<8x128xf32> -> vector<8x128xf32>
    %c649 = arith.constant 649 : index
    %c0_39 = arith.constant 0 : index
    %99 = vector.load %arg2[%c649, %c0_39] : memref<656x128xf32, #tpu.memory_space<vmem>>, vector<1x128xf32>
    %100 = vector.broadcast %99 : vector<1x128xf32> to vector<8x128xf32>
    %101 = arith.addf %98, %100 : vector<8x128xf32>
    %c650 = arith.constant 650 : index
    %c0_40 = arith.constant 0 : index
    %102 = vector.load %arg2[%c650, %c0_40] : memref<656x128xf32, #tpu.memory_space<vmem>>, vector<1x128xf32>
    %c651 = arith.constant 651 : index
    %c0_41 = arith.constant 0 : index
    %103 = vector.load %arg2[%c651, %c0_41] : memref<656x128xf32, #tpu.memory_space<vmem>>, vector<1x128xf32>
    %cst_42 = arith.constant dense<0.000000e+00> : vector<128xf32>
    %104 = vector.multi_reduction <add>, %101, %cst_42 [0] : vector<8x128xf32> to vector<128xf32>
    %105 = vector.shape_cast %104 : vector<128xf32> to vector<1x128xf32>
    %cst_43 = arith.constant 8.000000e+00 : f32
    %106 = vector.broadcast %cst_43 : f32 to vector<1x128xf32>
    %107 = arith.divf %105, %106 : vector<1x128xf32>
    %108 = arith.mulf %101, %101 : vector<8x128xf32>
    %cst_44 = arith.constant dense<0.000000e+00> : vector<128xf32>
    %109 = vector.multi_reduction <add>, %108, %cst_44 [0] : vector<8x128xf32> to vector<128xf32>
    %110 = vector.shape_cast %109 : vector<128xf32> to vector<1x128xf32>
    %cst_45 = arith.constant 8.000000e+00 : f32
    %111 = vector.broadcast %cst_45 : f32 to vector<1x128xf32>
    %112 = arith.divf %110, %111 : vector<1x128xf32>
    %113 = arith.mulf %107, %107 : vector<1x128xf32>
    %114 = arith.subf %112, %113 : vector<1x128xf32>
    %cst_46 = arith.constant 0.000000e+00 : f32
    %115 = vector.broadcast %cst_46 : f32 to vector<1x128xf32>
    %116 = arith.maximumf %114, %115 : vector<1x128xf32>
    %cst_47 = arith.constant 9.99999974E-6 : f32
    %117 = vector.broadcast %cst_47 : f32 to vector<1x128xf32>
    %118 = arith.addf %116, %117 : vector<1x128xf32>
    %119 = math.rsqrt %118 : vector<1x128xf32>
    %120 = arith.mulf %102, %119 : vector<1x128xf32>
    %121 = arith.mulf %107, %120 : vector<1x128xf32>
    %122 = arith.subf %103, %121 : vector<1x128xf32>
    %123 = vector.broadcast %120 : vector<1x128xf32> to vector<8x128xf32>
    %124 = arith.mulf %101, %123 : vector<8x128xf32>
    %125 = vector.broadcast %122 : vector<1x128xf32> to vector<8x128xf32>
    %126 = arith.addf %124, %125 : vector<8x128xf32>
    %cst_48 = arith.constant 0.000000e+00 : f32
    %127 = vector.broadcast %cst_48 : f32 to vector<8x128xf32>
    %128 = arith.maximumf %126, %127 : vector<8x128xf32>
    %c512 = arith.constant 512 : index
    %c0_49 = arith.constant 0 : index
    %129 = vector.load %arg2[%c512, %c0_49] : memref<656x128xf32, #tpu.memory_space<vmem>>, vector<128x128xf32>
    %cst_50 = arith.constant dense<0.000000e+00> : vector<8x128xf32>
    %130 = tpu.matmul %128, %129, %cst_50 {dimension_numbers = #tpu.dot_dimension_numbers<[1], [0], [0], [1], [0, 0, 1, 1], [], []>} : vector<8x128xf32>, vector<128x128xf32>, vector<8x128xf32> -> vector<8x128xf32>
    %c652 = arith.constant 652 : index
    %c0_51 = arith.constant 0 : index
    %131 = vector.load %arg2[%c652, %c0_51] : memref<656x128xf32, #tpu.memory_space<vmem>>, vector<1x128xf32>
    %132 = vector.broadcast %131 : vector<1x128xf32> to vector<8x128xf32>
    %133 = arith.addf %130, %132 : vector<8x128xf32>
    %134 = vector.extract_strided_slice %133 {offsets = [0, 0], sizes = [8, 16], strides = [1, 1]} : vector<8x128xf32> to vector<8x16xf32>
    %135 = vector.extract_strided_slice %133 {offsets = [0, 16], sizes = [8, 16], strides = [1, 1]} : vector<8x128xf32> to vector<8x16xf32>
    %cst_52 = arith.constant 5.000000e-01 : f32
    %136 = vector.broadcast %cst_52 : f32 to vector<8x16xf32>
    %137 = arith.mulf %136, %135 : vector<8x16xf32>
    %138 = math.exp %137 : vector<8x16xf32>
    %c0_53 = arith.constant 0 : index
    %c0_54 = arith.constant 0 : index
    %139 = vector.load %arg1[%c0_53, %c0_54] : memref<8x16xf32, #tpu.memory_space<vmem>>, vector<8x16xf32>
    %140 = arith.mulf %139, %138 : vector<8x16xf32>
    %141 = arith.addf %140, %134 : vector<8x16xf32>
    %142 = vector.extract_strided_slice %133 {offsets = [0, 0], sizes = [8, 32], strides = [1, 1]} : vector<8x128xf32> to vector<8x32xf32>
    %c0_55 = arith.constant 0 : index
    %c0_56 = arith.constant 0 : index
    %143 = vector.load %arg3[%c0_55, %c0_56] : memref<8x48xf32, #tpu.memory_space<vmem>>, vector<8x32xf32>
    tpu.vector_store %arg3[%c0_55, %c0_56], %142 {strides = array<i32>} : memref<8x48xf32, #tpu.memory_space<vmem>>, vector<8x32xf32>,
    %c0_57 = arith.constant 0 : index
    %c32 = arith.constant 32 : index
    %144 = vector.load %arg3[%c0_57, %c32] : memref<8x48xf32, #tpu.memory_space<vmem>>, vector<8x16xf32>
    tpu.vector_store %arg3[%c0_57, %c32], %141 {strides = array<i32>} : memref<8x48xf32, #tpu.memory_space<vmem>>, vector<8x16xf32>,
    return
  }
}

</mosaic_0001>

<bundles_post_ra>
// kernel: encoder_forward.1
= control target key start
LH: loop header
LB: loop body
LE: loop exit
PB: predicated region body
PF: predicated region fallthrough
CT: control target
= control target key end

     0   :  { %8 = vsyncpa [#allocation3], 0  ;;  %s456_s15 = smov [#allocation2]   ;;  %s457_s17 = smov 128   ;;  %s507_s0 = inlined_call_operand.vmem [shape: f32[8,128], index: 0, kind: input, shape index: {}]   ;;  %s508_s1 = inlined_call_operand.vmem [shape: f32[8,16], index: 1, kind: input, shape index: {}]   ;;  %s509_s2 = inlined_call_operand.hbm [shape: f32[656,128], index: 2, kind: input, shape index: {}]   ;;  %s510_s3 = inlined_call_operand.vmem [shape: f32[8,48], index: 3, kind: output, shape index: {}]  }
   0x1   :  { %s17_s14 = sshll.u32 %s509_s2, 4  ;;  %s19_s16 = sshll.u32 %s456_s15, 4  ;;  %s18_s14 = int_to_ptr.hbm [resolvable:$true] %s17_s14  ;;  %s20_s16 = int_to_ptr.vmem [resolvable:$true] %s19_s16 }
   0x2   :  { %s458_s18 = smov 8  }
   0x3   :  { %25 = dma.hbm_to_vmem [thread:$0]  %s18_s14, 10496, %s20_s16, [#allocation3], %s457_s17, %s457_s17, %s458_s18  }
   0x4   :  { %454 = dma.done.wait [#allocation3], 10496  }
   0x5   :  { %455 = vsyncadd [#allocation3], 4294956800  ;;  %v46_v0 = vld [vmem:[#allocation2 + $0x78] sm:$0xff]  ;;  %v45_v1 = vld [vmem:[#allocation2 + $0x70] sm:$0xff]  ;;  %v459_v21 = vmov 8.0   ;;  %vm394_vm13 = vcmask 261120  }
   0x6   :  { %49 = vmatpush.msra.mxu0 %v46_v0  ;;  %v44_v2 = vld [vmem:[#allocation2 + $0x68] sm:$0xff]  ;;  %v43_v3 = vld [vmem:[#allocation2 + $0x60] sm:$0xff]  ;;  %v42_v4 = vld [vmem:[#allocation2 + $0x58] sm:$0xff]  ;;  %418 = vrcp.f32 %v459_v21  ;;  %s460_s21 = smov 112   ;;  %s461_s24 = smov 32   ;;  %vm400_vm14 = vcmask 392448  }
   0x7   :  { %v41_v5 = vld [vmem:[#allocation2 + $0x50] sm:$0xff]  ;;  %v40_v6 = vld [vmem:[#allocation2 + $0x48] sm:$0xff]  ;;  %v39_v7 = vld [vmem:[#allocation2 + $0x40] sm:$0xff] }
   0x8   :  { %50 = vmatpush.msra.mxu0 %v45_v1  ;;  %v38_v8 = vld [vmem:[#allocation2 + $0x38] sm:$0xff]  ;;  %v37_v9 = vld [vmem:[#allocation2 + $0x30] sm:$0xff]  ;;  %v36_v10 = vld [vmem:[#allocation2 + $0x28] sm:$0xff] }
   0x9   :  { %v35_v11 = vld [vmem:[#allocation2 + $0x20] sm:$0xff]  ;;  %v34_v12 = vld [vmem:[#allocation2 + $0x18] sm:$0xff]  ;;  %v33_v13 = vld [vmem:[#allocation2 + $0x10] sm:$0xff] }
   0xa   :  { %51 = vmatpush.msra.mxu0 %v44_v2  ;;  %v32_v14 = vld [vmem:[#allocation2 + $0x8] sm:$0xff]  ;;  %v31_v15 = vld [vmem:[#allocation2] sm:$0xff]  ;;  %v130_v17 = vld [vmem:[#allocation2 + $0xf8] sm:$0xff] }
   0xb   :  { %v30_v16 = vld [vmem:[%s507_s0] sm:$0xff]  ;;  %v129_v18 = vld [vmem:[#allocation2 + $0xf0] sm:$0xff]  ;;  %133 = vmatpush.msra.mxu1 %v130_v17  ;;  %v128_v19 = vld [vmem:[#allocation2 + $0xe8] sm:$0xff] }
   0xc   :  { %52 = vmatpush.msra.mxu0 %v43_v3  ;;  %v127_v20 = vld [vmem:[#allocation2 + $0xe0] sm:$0xff]  ;;  %v126_v22 = vld [vmem:[#allocation2 + $0xd8] sm:$0xff]  ;;  %v125_v23 = vld [vmem:[#allocation2 + $0xd0] sm:$0xff]  ;;  %v419_v24 = vpop.eup %418 }
   0xd   :  { %134 = vmatpush.msra.mxu1 %v129_v18  ;;  %v124_v25 = vld [vmem:[#allocation2 + $0xc8] sm:$0xff]  ;;  %v123_v26 = vld [vmem:[#allocation2 + $0xc0] sm:$0xff]  ;;  %v78_v27 = vmul.f32 8.0, %v419_v24  ;;  %v122_v29 = vld [vmem:[#allocation2 + $0xb8] sm:$0xff]  ;;  %vm82_vm0 = vweird.f32 %v419_v24 }
   0xe   :  { %53 = vmatpush.msra.mxu0 %v42_v4  ;;  %v413_v28 = vld [vmem:[#allocation2 + $0x280] ss:$0 sm:$0xff]  ;;  %v121_v30 = vld [vmem:[#allocation2 + $0xb0] sm:$0xff]  ;;  %v120_v34 = vld [vmem:[#allocation2 + $0xa8] sm:$0xff] }
   0xf   :  { %135 = vmatpush.msra.mxu1 %v128_v19  ;;  %v79_v32 = vsub.f32 1.0, %v78_v27  ;;  %v119_v37 = vld [vmem:[#allocation2 + $0xa0] sm:$0xff]  ;;  %v118_v41 = vld [vmem:[#allocation2 + $0x98] sm:$0xff]  ;;  %v117_v44 = vld [vmem:[#allocation2 + $0x90] sm:$0xff] }
  0x10   :  { %54 = vmatpush.msra.mxu0 %v41_v5  ;;  %v116_v48 = vld [vmem:[#allocation2 + $0x88] sm:$0xff]  ;;  %v115_v50 = vld [vmem:[#allocation2 + $0x80] sm:$0xff]  ;;  %v203_v19 = vld [vmem:[#allocation2 + $0x158] sm:$0xff] }
  0x11   :  { %136 = vmatpush.msra.mxu1 %v127_v20  ;;  %v80_v38 = vmul.f32 %v419_v24, %v79_v32  ;;  %v69_v3 = vld [vmem:[#allocation2 + $0x281] sm:$0x1]  ;;  %v205_v17 = vld [vmem:[#allocation2 + $0x168] sm:$0xff]  ;;  %v202_v20 = vld [vmem:[#allocation2 + $0x150] sm:$0xff] }
  0x12   :  { %55 = vmatpush.msra.mxu0 %v40_v6  ;;  %v204_v18 = vld [vmem:[#allocation2 + $0x160] sm:$0xff]  ;;  %v201_v21 = vld [vmem:[#allocation2 + $0x148] sm:$0xff] }
  0x13   :  { %137 = vmatpush.msra.mxu1 %v126_v22  ;;  %v81_v45 = vadd.f32 %v419_v24, %v80_v38  ;;  %v200_v22 = vld [vmem:[#allocation2 + $0x140] sm:$0xff] }
  0x14   :  { %56 = vmatpush.msra.mxu0 %v39_v7  ;;  %v70_v7 = vld [vmem:[#allocation2 + $0x282] sm:$0x1] }
  0x15   :  { %138 = vmatpush.msra.mxu1 %v125_v23  ;;  %v488_v52 = vsel %vm82_vm0, %v419_v24, %v81_v45  ;;  %v414_v23 = vld [vmem:[#allocation2 + $0x283] ss:$0 sm:$0xff]  ;;  %v199_v24 = vld [vmem:[#allocation2 + $0x138] sm:$0xff] }
  0x16   :  { %57 = vmatpush.msra.mxu0 %v38_v8 }
  0x17   :  { %139 = vmatpush.msra.mxu1 %v124_v25  ;;  %v198_v25 = vld [vmem:[#allocation2 + $0x130] sm:$0xff] }
  0x18   :  { %58 = vmatpush.msra.mxu0 %v37_v9 }
  0x19   :  { %140 = vmatpush.msra.mxu1 %v123_v26 }
  0x1a   :  { %59 = vmatpush.msra.mxu0 %v36_v10 }
  0x1b   :  { %141 = vmatpush.msra.mxu1 %v122_v29 }
  0x1c   :  { %60 = vmatpush.msra.mxu0 %v35_v11 }
  0x1d   :  { %142 = vmatpush.msra.mxu1 %v121_v30 }
  0x1e   :  { %61 = vmatpush.msra.mxu0 %v34_v12 }
  0x1f   :  { %143 = vmatpush.msra.mxu1 %v120_v34  ;;  %v195_v34 = vld [vmem:[#allocation2 + $0x118] sm:$0xff] }
  0x20   :  { %62 = vmatpush.msra.mxu0 %v33_v13 }
  0x21   :  { %144 = vmatpush.msra.mxu1 %v119_v37  ;;  %v194_v37 = vld [vmem:[#allocation2 + $0x110] sm:$0xff] }
  0x22   :  { %63 = vmatpush.msra.mxu0 %v32_v14 }
  0x23   :  { %145 = vmatpush.msra.mxu1 %v118_v41 }
  0x24   :  { %64 = vmatpush.msra.mxu0 %v31_v15  ;;  %v207_v15 = vld [vmem:[#allocation2 + $0x178] sm:$0xff] }
  0x25   :  { %65 = vmatmul.f32.vlgmr.msra.gmra.mxu0 %v30_v16  ;;  %146 = vmatpush.msra.mxu1 %v117_v44  ;;  %v206_v16 = vld [vmem:[#allocation2 + $0x170] sm:$0xff] }
  0x26   :  { %210 = vmatpush.msra.mxu2 %v207_v15  ;;  %v415_v15 = vld [vmem:[#allocation2 + $0x286] ss:$0 sm:$0xff] }
  0x27   :  { %147 = vmatpush.msra.mxu1 %v116_v48 }
  0x28   :  { %211 = vmatpush.msra.mxu2 %v206_v16  ;;  %v276_v16 = vld [vmem:[#allocation2 + $0x1b8] sm:$0xff] }
  0x29   :  { %148 = vmatpush.msra.mxu1 %v115_v50 }
  0x2a   :  { %212 = vmatpush.msra.mxu2 %v205_v17  ;;  %v275_v17 = vld [vmem:[#allocation2 + $0x1b0] sm:$0xff] }
  0x2c   :  { %213 = vmatpush.msra.mxu2 %v204_v18 }
  0x2e   :  { %214 = vmatpush.msra.mxu2 %v203_v19 }
  0x30   :  { %215 = vmatpush.msra.mxu2 %v202_v20  ;;  %v274_v20 = vld [vmem:[#allocation2 + $0x1a8] sm:$0xff] }
  0x32   :  { %216 = vmatpush.msra.mxu2 %v201_v21 }
  0x34   :  { %217 = vmatpush.msra.mxu2 %v200_v22 }
  0x36   :  { %218 = vmatpush.msra.mxu2 %v199_v24 }
  0x38   :  { %219 = vmatpush.msra.mxu2 %v198_v25 }
  0xa2   :  { %v66_v31 = vpop.f32.mrf.mxu0 }
  0xa3   :  { %v67_v33 = vadd.f32 %v413_v28, %v66_v31  ;;  %v197_v28 = vld [vmem:[#allocation2 + $0x128] sm:$0xff]  ;;  %v196_v31 = vld [vmem:[#allocation2 + $0x120] sm:$0xff] }
  0xa4   :  { %220 = vmatpush.msra.mxu2 %v197_v28 }
  0xa5   :  { %v71_v35 = vrot.slane %v67_v33, 4  ;;  %v85_v36 = vmul.f32 %v67_v33, %v67_v33 }
  0xa6   :  { %221 = vmatpush.msra.mxu2 %v196_v31 }
  0xa7   :  { %v72_v39 = vadd.f32 %v71_v35, %v67_v33  ;;  %v86_v40 = vrot.slane %v85_v36, 4 }
  0xa8   :  { %222 = vmatpush.msra.mxu2 %v195_v34  ;;  %v269_v34 = vld [vmem:[#allocation2 + $0x180] sm:$0xff] }
  0xa9   :  { %v73_v42 = vrot.slane %v72_v39, 2  ;;  %v87_v43 = vadd.f32 %v86_v40, %v85_v36  ;;  %v193_v40 = vld [vmem:[#allocation2 + $0x108] sm:$0xff] }
  0xaa   :  { %223 = vmatpush.msra.mxu2 %v194_v37 }
  0xab   :  { %v74_v46 = vadd.f32 %v73_v42, %v72_v39  ;;  %v88_v47 = vrot.slane %v87_v43, 2  ;;  %v192_v42 = vld [vmem:[#allocation2 + $0x100] sm:$0xff] }
  0xac   :  { %224 = vmatpush.msra.mxu2 %v193_v40 }
  0xad   :  { %v89_v49 = vadd.f32 %v88_v47, %v87_v43  ;;  %v75_v51 = vrot.slane %v74_v46, 1 }
  0xae   :  { %225 = vmatpush.msra.mxu2 %v192_v42 }
  0xaf   :  { %v90_v53 = vrot.slane %v89_v49, 1  ;;  %v76_v54 = vadd.f32 %v75_v51, %v74_v46 }
  0xb1   :  { %v91_v55 = vadd.f32 %v90_v53, %v89_v49  ;;  %v84_v56 = vmul.f32 %v488_v52, %v76_v54 }
  0xb3   :  { %v92_v57 = vmul.f32 %v91_v55, %v488_v52  ;;  %v93_v58 = vmul.f32 %v84_v56, %v84_v56 }
  0xb5   :  { %v94_v59 = vsub.f32 %v92_v57, %v93_v58 }
  0xb7   :  { %v95_v60 = vmax.f32 %v94_v59, 0.0  ;;  %v153_v59 = vld [vmem:[#allocation2 + $0x284] sm:$0x1] }
  0xb9   :  { %v96_v61 = vadd.f32 1e-05, %v95_v60 }
  0xbb   :  { %420 = vrsqrt.f32 %v96_v61  ;;  %vm103_vm2 = vweird.f32 %v96_v61 }
  0xc1   :  { %v421_v62 = vpop.eup %420 }
  0xc2   :  { %v98_v63 = vmul.f32 %v421_v62, %v96_v61  ;;  %vm104_vm1 = vweird.f32 %v421_v62 }
  0xc3   :  { %vm105_vm3 = vmor %vm103_vm2, %vm104_vm1 }
  0xc4   :  { %v99_v0 = vmul.f32 %v421_v62, %v98_v63  ;;  %v154_v63 = vld [vmem:[#allocation2 + $0x285] sm:$0x1] }
  0xc6   :  { %v100_v1 = vmul.f32 0.5, %v99_v0 }
  0xc8   :  { %v101_v2 = vsub.f32 1.5, %v100_v1 }
  0xca   :  { %v102_v4 = vmul.f32 %v421_v62, %v101_v2 }
  0xcc   :  { %v106_v5 = vsel %vm105_vm3, %v421_v62, %v102_v4 }
  0xcd   :  { %v107_v6 = vmul.f32 %v106_v5, %v69_v3 }
  0xcf   :  { %v108_v8 = vmul.f32 %v107_v6, %v84_v56  ;;  %v110_v9 = vperm.slane %v107_v6, 0 }
  0xd1   :  { %v109_v10 = vsub.f32 %v70_v7, %v108_v8  ;;  %v111_v11 = vmul.f32 %v110_v9, %v67_v33  ;;  %v284_v7 = vld [vmem:[#allocation2 + $0x1f8] sm:$0xff]  ;;  %v283_v8 = vld [vmem:[#allocation2 + $0x1f0] sm:$0xff]  ;;  %v282_v9 = vld [vmem:[#allocation2 + $0x1e8] sm:$0xff] }
  0xd2   :  { %287 = vmatpush.msra.mxu3 %v284_v7  ;;  %v354_v7 = vld [vmem:[#allocation2 + $0x240] sm:$0xff] }
  0xd3   :  { %v112_v12 = vperm.slane %v109_v10, 0  ;;  %v281_v10 = vld [vmem:[#allocation2 + $0x1e0] sm:$0xff] }
  0xd4   :  { %288 = vmatpush.msra.mxu3 %v283_v8  ;;  %v353_v8 = vld [vmem:[#allocation2 + $0x238] sm:$0xff] }
  0xd5   :  { %v113_v13 = vadd.f32 %v112_v12, %v111_v11  ;;  %v280_v11 = vld [vmem:[#allocation2 + $0x1d8] sm:$0xff]  ;;  %v279_v12 = vld [vmem:[#allocation2 + $0x1d0] sm:$0xff] }
  0xd6   :  { %289 = vmatpush.msra.mxu3 %v282_v9 }
  0xd7   :  { %v114_v14 = vmax.f32 %v113_v13, 0.0  ;;  %v278_v13 = vld [vmem:[#allocation2 + $0x1c8] sm:$0xff] }
  0xd8   :  { %290 = vmatpush.msra.mxu3 %v281_v10 }
  0xd9   :  { %149 = vmatmul.f32.vlgmr.msra.gmra.mxu1 %v114_v14  ;;  %v277_v14 = vld [vmem:[#allocation2 + $0x1c0] sm:$0xff] }
  0xda   :  { %291 = vmatpush.msra.mxu3 %v280_v11  ;;  %v352_v11 = vld [vmem:[#allocation2 + $0x230] sm:$0xff] }
  0xdc   :  { %292 = vmatpush.msra.mxu3 %v279_v12 }
  0xde   :  { %293 = vmatpush.msra.mxu3 %v278_v13 }
  0xe0   :  { %294 = vmatpush.msra.mxu3 %v277_v14  ;;  %v351_v14 = vld [vmem:[#allocation2 + $0x228] sm:$0xff] }
  0xe2   :  { %295 = vmatpush.msra.mxu3 %v276_v16 }
  0xe4   :  { %296 = vmatpush.msra.mxu3 %v275_v17  ;;  %v350_v17 = vld [vmem:[#allocation2 + $0x220] sm:$0xff] }
  0xe6   :  { %297 = vmatpush.msra.mxu3 %v274_v20  ;;  %v349_v20 = vld [vmem:[#allocation2 + $0x218] sm:$0xff] }
 0x156   :  { %v150_v26 = vpop.f32.mrf.mxu1 }
 0x157   :  { %v151_v27 = vadd.f32 %v414_v23, %v150_v26  ;;  %v273_v23 = vld [vmem:[#allocation2 + $0x1a0] sm:$0xff]  ;;  %v272_v26 = vld [vmem:[#allocation2 + $0x198] sm:$0xff] }
 0x158   :  { %298 = vmatpush.msra.mxu3 %v273_v23  ;;  %v348_v23 = vld [vmem:[#allocation2 + $0x210] sm:$0xff] }
 0x159   :  { %v155_v29 = vrot.slane %v151_v27, 4  ;;  %v162_v30 = vmul.f32 %v151_v27, %v151_v27 }
 0x15a   :  { %299 = vmatpush.msra.mxu3 %v272_v26  ;;  %v347_v26 = vld [vmem:[#allocation2 + $0x208] sm:$0xff] }
 0x15b   :  { %v156_v32 = vadd.f32 %v155_v29, %v151_v27  ;;  %v163_v33 = vrot.slane %v162_v30, 4  ;;  %v271_v29 = vld [vmem:[#allocation2 + $0x190] sm:$0xff] }
 0x15c   :  { %300 = vmatpush.msra.mxu3 %v271_v29  ;;  %v346_v29 = vld [vmem:[#allocation2 + $0x200] sm:$0xff] }
 0x15d   :  { %v157_v35 = vrot.slane %v156_v32, 2  ;;  %v164_v36 = vadd.f32 %v163_v33, %v162_v30 }
 0x15f   :  { %v158_v38 = vadd.f32 %v157_v35, %v156_v32  ;;  %v165_v39 = vrot.slane %v164_v36, 2  ;;  %v270_v32 = vld [vmem:[#allocation2 + $0x188] sm:$0xff] }
 0x160   :  { %301 = vmatpush.msra.mxu3 %v270_v32 }
 0x161   :  { %v166_v41 = vadd.f32 %v165_v39, %v164_v36  ;;  %v159_v43 = vrot.slane %v158_v38, 1 }
 0x162   :  { %302 = vmatpush.msra.mxu3 %v269_v34 }
 0x163   :  { %v167_v44 = vrot.slane %v166_v41, 1  ;;  %v160_v45 = vadd.f32 %v159_v43, %v158_v38 }
 0x165   :  { %v168_v46 = vadd.f32 %v167_v44, %v166_v41  ;;  %v161_v47 = vmul.f32 %v160_v45, %v488_v52 }
 0x167   :  { %v169_v48 = vmul.f32 %v168_v46, %v488_v52  ;;  %v170_v49 = vmul.f32 %v161_v47, %v161_v47 }
 0x169   :  { %v171_v50 = vsub.f32 %v169_v48, %v170_v49 }
 0x16b   :  { %v172_v51 = vmax.f32 %v171_v50, 0.0  ;;  %v230_v50 = vld [vmem:[#allocation2 + $0x287] sm:$0x1] }
 0x16d   :  { %v173_v53 = vadd.f32 1e-05, %v172_v51 }
 0x16f   :  { %422 = vrsqrt.f32 %v173_v53  ;;  %vm180_vm5 = vweird.f32 %v173_v53 }
 0x175   :  { %v423_v54 = vpop.eup %422 }
 0x176   :  { %v175_v55 = vmul.f32 %v423_v54, %v173_v53  ;;  %vm181_vm4 = vweird.f32 %v423_v54 }
 0x177   :  { %vm182_vm6 = vmor %vm180_vm5, %vm181_vm4 }
 0x178   :  { %v176_v56 = vmul.f32 %v423_v54, %v175_v55  ;;  %v231_v55 = vld [vmem:[#allocation2 + $0x288] sm:$0x1] }
 0x17a   :  { %v177_v57 = vmul.f32 0.5, %v176_v56 }
 0x17c   :  { %v178_v58 = vsub.f32 1.5, %v177_v57 }
 0x17e   :  { %v179_v60 = vmul.f32 %v423_v54, %v178_v58 }
 0x180   :  { %v183_v61 = vsel %vm182_vm6, %v423_v54, %v179_v60 }
 0x181   :  { %v184_v62 = vmul.f32 %v183_v61, %v153_v59 }
 0x183   :  { %v185_v0 = vmul.f32 %v184_v62, %v161_v47  ;;  %v187_v1 = vperm.slane %v184_v62, 0 }
 0x185   :  { %v186_v2 = vsub.f32 %v154_v63, %v185_v0  ;;  %v188_v3 = vmul.f32 %v187_v1, %v151_v27  ;;  %v361_v63 = vld [vmem:[#allocation2 + $0x278] sm:$0xff]  ;;  %v360_v0 = vld [vmem:[#allocation2 + $0x270] sm:$0xff]  ;;  %v359_v1 = vld [vmem:[#allocation2 + $0x268] sm:$0xff] }
 0x186   :  { %364 = vmatpush.msrb.mxu0 %v361_v63 }
 0x187   :  { %v189_v4 = vperm.slane %v186_v2, 0  ;;  %v358_v2 = vld [vmem:[#allocation2 + $0x260] sm:$0xff] }
 0x188   :  { %365 = vmatpush.msrb.mxu0 %v360_v0 }
 0x189   :  { %v190_v5 = vadd.f32 %v189_v4, %v188_v3  ;;  %v357_v3 = vld [vmem:[#allocation2 + $0x258] sm:$0xff]  ;;  %v356_v4 = vld [vmem:[#allocation2 + $0x250] sm:$0xff] }
 0x18a   :  { %366 = vmatpush.msrb.mxu0 %v359_v1 }
 0x18b   :  { %v191_v6 = vmax.f32 %v190_v5, 0.0  ;;  %v355_v5 = vld [vmem:[#allocation2 + $0x248] sm:$0xff] }
 0x18c   :  { %367 = vmatpush.msrb.mxu0 %v358_v2 }
 0x18d   :  { %226 = vmatmul.f32.vlgmr.msra.gmra.mxu2 %v191_v6  ;;  %v416_v6 = vld [vmem:[#allocation2 + $0x289] ss:$0 sm:$0xff] }
 0x18e   :  { %368 = vmatpush.msrb.mxu0 %v357_v3 }
 0x190   :  { %369 = vmatpush.msrb.mxu0 %v356_v4 }
 0x192   :  { %370 = vmatpush.msrb.mxu0 %v355_v5 }
 0x194   :  { %371 = vmatpush.msrb.mxu0 %v354_v7 }
 0x196   :  { %372 = vmatpush.msrb.mxu0 %v353_v8 }
 0x198   :  { %373 = vmatpush.msrb.mxu0 %v352_v11 }
 0x19a   :  { %374 = vmatpush.msrb.mxu0 %v351_v14 }
 0x19c   :  { %375 = vmatpush.msrb.mxu0 %v350_v17 }
 0x19e   :  { %376 = vmatpush.msrb.mxu0 %v349_v20 }
 0x1a0   :  { %377 = vmatpush.msrb.mxu0 %v348_v23 }
 0x1a2   :  { %378 = vmatpush.msrb.mxu0 %v347_v26 }
 0x1a4   :  { %379 = vmatpush.msrb.mxu0 %v346_v29 }
 0x210   :  { %v227_v18 = vpop.f32.mrf.mxu2 }
 0x211   :  { %v228_v19 = vadd.f32 %v415_v15, %v227_v18 }
 0x213   :  { %v232_v21 = vrot.slane %v228_v19, 4  ;;  %v239_v22 = vmul.f32 %v228_v19, %v228_v19 }
 0x215   :  { %v233_v24 = vadd.f32 %v232_v21, %v228_v19  ;;  %v240_v25 = vrot.slane %v239_v22, 4 }
 0x217   :  { %v234_v27 = vrot.slane %v233_v24, 2  ;;  %v241_v28 = vadd.f32 %v240_v25, %v239_v22 }
 0x219   :  { %v235_v30 = vadd.f32 %v234_v27, %v233_v24  ;;  %v242_v31 = vrot.slane %v241_v28, 2 }
 0x21b   :  { %v243_v33 = vadd.f32 %v242_v31, %v241_v28  ;;  %v236_v35 = vrot.slane %v235_v30, 1 }
 0x21d   :  { %v244_v36 = vrot.slane %v243_v33, 1  ;;  %v237_v37 = vadd.f32 %v236_v35, %v235_v30 }
 0x21f   :  { %v245_v38 = vadd.f32 %v244_v36, %v243_v33  ;;  %v238_v39 = vmul.f32 %v237_v37, %v488_v52 }
 0x221   :  { %v246_v40 = vmul.f32 %v245_v38, %v488_v52  ;;  %v247_v41 = vmul.f32 %v238_v39, %v238_v39 }
 0x223   :  { %v248_v42 = vsub.f32 %v246_v40, %v247_v41 }
 0x225   :  { %v249_v43 = vmax.f32 %v248_v42, 0.0  ;;  %v307_v42 = vld [vmem:[#allocation2 + $0x28a] sm:$0x1] }
 0x227   :  { %v250_v44 = vadd.f32 1e-05, %v249_v43 }
 0x229   :  { %424 = vrsqrt.f32 %v250_v44  ;;  %vm257_vm8 = vweird.f32 %v250_v44 }
 0x22f   :  { %v425_v45 = vpop.eup %424 }
 0x230   :  { %v252_v46 = vmul.f32 %v425_v45, %v250_v44  ;;  %vm258_vm7 = vweird.f32 %v425_v45 }
 0x231   :  { %vm259_vm9 = vmor %vm257_vm8, %vm258_vm7 }
 0x232   :  { %v253_v47 = vmul.f32 %v425_v45, %v252_v46  ;;  %v308_v46 = vld [vmem:[#allocation2 + $0x28b] sm:$0x1] }
 0x234   :  { %v254_v48 = vmul.f32 0.5, %v253_v47 }
 0x236   :  { %v255_v49 = vsub.f32 1.5, %v254_v48 }
 0x238   :  { %v256_v51 = vmul.f32 %v425_v45, %v255_v49 }
 0x23a   :  { %v260_v53 = vsel %vm259_vm9, %v425_v45, %v256_v51 }
 0x23b   :  { %v261_v54 = vmul.f32 %v260_v53, %v230_v50 }
 0x23d   :  { %v262_v56 = vmul.f32 %v261_v54, %v238_v39  ;;  %v264_v57 = vperm.slane %v261_v54, 0  ;;  %v417_v54 = vld [vmem:[#allocation2 + $0x28c] ss:$0 sm:$0xff] }
 0x23f   :  { %v263_v58 = vsub.f32 %v231_v55, %v262_v56  ;;  %v265_v59 = vmul.f32 %v264_v57, %v228_v19 }
 0x241   :  { %v266_v60 = vperm.slane %v263_v58, 0 }
 0x243   :  { %v267_v61 = vadd.f32 %v266_v60, %v265_v59  ;;  %v387_v60 = vld [vmem:[%s508_s1] sm:$0xff] }
 0x245   :  { %v268_v62 = vmax.f32 %v267_v61, 0.0 }
 0x247   :  { %303 = vmatmul.f32.vlgmr.msra.gmra.mxu3 %v268_v62 }
 0x2ca   :  { %v304_v9 = vpop.f32.mrf.mxu3 }
 0x2cb   :  { %v305_v10 = vadd.f32 %v416_v6, %v304_v9 }
 0x2cd   :  { %v309_v12 = vrot.slane %v305_v10, 4  ;;  %v316_v13 = vmul.f32 %v305_v10, %v305_v10 }
 0x2cf   :  { %v310_v15 = vadd.f32 %v309_v12, %v305_v10  ;;  %v317_v16 = vrot.slane %v316_v13, 4 }
 0x2d1   :  { %v311_v18 = vrot.slane %v310_v15, 2  ;;  %v318_v19 = vadd.f32 %v317_v16, %v316_v13 }
 0x2d3   :  { %v312_v21 = vadd.f32 %v311_v18, %v310_v15  ;;  %v319_v22 = vrot.slane %v318_v19, 2 }
 0x2d5   :  { %v313_v24 = vrot.slane %v312_v21, 1  ;;  %v320_v25 = vadd.f32 %v319_v22, %v318_v19 }
 0x2d7   :  { %v314_v27 = vadd.f32 %v313_v24, %v312_v21  ;;  %v321_v28 = vrot.slane %v320_v25, 1 }
 0x2d9   :  { %v322_v30 = vadd.f32 %v321_v28, %v320_v25  ;;  %v315_v31 = vmul.f32 %v314_v27, %v488_v52 }
 0x2db   :  { %v323_v32 = vmul.f32 %v322_v30, %v488_v52  ;;  %v324_v33 = vmul.f32 %v315_v31, %v315_v31 }
 0x2dd   :  { %v325_v34 = vsub.f32 %v323_v32, %v324_v33 }
 0x2df   :  { %v326_v35 = vmax.f32 %v325_v34, 0.0 }
 0x2e1   :  { %v327_v36 = vadd.f32 1e-05, %v326_v35 }
 0x2e3   :  { %426 = vrsqrt.f32 %v327_v36  ;;  %vm334_vm11 = vweird.f32 %v327_v36 }
 0x2e9   :  { %v427_v37 = vpop.eup %426 }
 0x2ea   :  { %v329_v38 = vmul.f32 %v427_v37, %v327_v36  ;;  %vm335_vm10 = vweird.f32 %v427_v37 }
 0x2eb   :  { %vm336_vm12 = vmor %vm334_vm11, %vm335_vm10 }
 0x2ec   :  { %v330_v39 = vmul.f32 %v427_v37, %v329_v38 }
 0x2ee   :  { %v331_v40 = vmul.f32 0.5, %v330_v39 }
 0x2f0   :  { %v332_v41 = vsub.f32 1.5, %v331_v40 }
 0x2f2   :  { %v333_v43 = vmul.f32 %v427_v37, %v332_v41 }
 0x2f4   :  { %v337_v44 = vsel %vm336_vm12, %v427_v37, %v333_v43 }
 0x2f5   :  { %v338_v45 = vmul.f32 %v337_v44, %v307_v42 }
 0x2f7   :  { %v339_v47 = vmul.f32 %v338_v45, %v315_v31  ;;  %v341_v52 = vperm.slane %v338_v45, 0 }
 0x2f9   :  { %v340_v48 = vsub.f32 %v308_v46, %v339_v47  ;;  %v342_v49 = vmul.f32 %v341_v52, %v305_v10 }
 0x2fb   :  { %v343_v50 = vperm.slane %v340_v48, 0 }
 0x2fd   :  { %v344_v51 = vadd.f32 %v343_v50, %v342_v49 }
 0x2ff   :  { %v345_v53 = vmax.f32 %v344_v51, 0.0 }
 0x301   :  { %380 = vmatmul.f32.vlgmr.msrb.gmra.mxu0 %v345_v53 }
 0x37e   :  { %v381_v55 = vpop.f32.mrf.mxu0 }
 0x37f   :  { %v382_v56 = vadd.f32 %v417_v54, %v381_v55 }
 0x381   :  { %v384_v57 = vmul.f32 0.5, %v382_v56  ;;  %395 = vst.msk [vmem:[%s510_s3] sm:$0xff] %vm394_vm13, %v382_v56 }
 0x383   :  { %v385_v58 = vmul.f32 1.442695, %v384_v57 }
 0x385   :  { %428 = vpow2.f32 %v385_v58 }
 0x38b   :  { %v429_v59 = vpop.eup %428 }
 0x38c   :  { %389 = vrot.lane.b32.xlu0 %v429_v59, %s460_s21 }
 0x3fe   :  { %v390_v61 = vpop.permute.xlu0 %389 }
 0x3ff   :  { %v392_v62 = vmul.f32 %v390_v61, %v387_v60 }
 0x401   :  { %v393_v63 = vadd.f32 %v392_v62, %v382_v56 }
 0x403   :  { %397 = vrot.lane.b32.xlu0 %v393_v63, %s461_s24 }
 0x475   :  { %v398_v0 = vpop.permute.xlu0 %397 }
 0x476   :  { %401 = vst.msk [vmem:[%s510_s3] sm:$0xff] %vm400_vm14, %v398_v0 }
 0x477   :  { %406 = vsyncpa [#allocation3], 1 }

</bundles_post_ra>
